<compile_context>
chip_gen: v6e
topology: v6e:2x2x1
jax: 0.10.0
libtpu: 0.0.40
codegen_flags: <defaults>
</compile_context>

<pallas_src>
import functools

import jax
import jax.numpy as jnp
import numpy as np
from jax.experimental import pallas as pl
from jax.experimental.pallas import tpu as pltpu

_EPS = 1e-5


# ---------------------------------------------------------------------------
# Kernels
# ---------------------------------------------------------------------------
def _cam2_fused_kernel(x_ref, w_in_ref, gamma_ref, beta_ref, w_out_ref,
                       mask_ref, out_ref, *, samples_per_block):
    """Whole-sample path: (SB, C, P) block, full instance norm in one pass."""
    w_in = w_in_ref[...]          # (Dpad, C)  bf16
    w_out = w_out_ref[...]        # (C, Dpad)  bf16
    gamma = gamma_ref[...]        # (Dpad, 1)  f32
    beta = beta_ref[...]          # (Dpad, 1)  f32
    mask = mask_ref[...]          # (C, 1)     f32  (1.0 on the x4 rows)

    for i in range(samples_per_block):        # static, small unroll
        x = x_ref[i]                                              # (C, P) bf16
        # Fused input 1x1 convs (block-diagonal matmul).
        y = jnp.dot(w_in, x, preferred_element_type=jnp.float32)  # (Dpad, P)
        # InstanceNorm stats in one traversal of y (f32 accumulation).
        mu = jnp.mean(y, axis=1, keepdims=True)
        msq = jnp.mean(y * y, axis=1, keepdims=True)
        var = jnp.maximum(msq - mu * mu, 0.0)
        # Collapse normalize + affine into a single scale/bias pass.
        s = gamma * jax.lax.rsqrt(var + _EPS)                     # (Dpad, 1)
        t = beta - mu * s
        yn = (y * s + t).astype(jnp.bfloat16)
        # Fused output 1x1 convs; bottom slab of W_out already sums r+g+b.
        out = jnp.dot(w_out, yn, preferred_element_type=jnp.float32)  # (C, P)
        # base += x4 via the precomputed row mask (no iota / where).
        out_ref[i] = (out + x.astype(jnp.float32) * mask).astype(out_ref.dtype)


def _cam2_stats_kernel(x_ref, w_in_ref, sum_ref, sumsq_ref):
    """P-tiled pass 1: accumulate per-(sample, channel) sum / sumsq of y."""
    @pl.when(pl.program_id(1) == 0)
    def _():
        sum_ref[...] = jnp.zeros_like(sum_ref)
        sumsq_ref[...] = jnp.zeros_like(sumsq_ref)

    y = jnp.dot(w_in_ref[...], x_ref[0],
                preferred_element_type=jnp.float32)               # (Dpad, TP)
    sum_ref[0] = sum_ref[0] + jnp.sum(y, axis=1, keepdims=True)
    sumsq_ref[0] = sumsq_ref[0] + jnp.sum(y * y, axis=1, keepdims=True)


def _cam2_apply_kernel(x_ref, s_ref, t_ref, w_in_ref, w_out_ref, mask_ref,
                       out_ref):
    """P-tiled pass 2: normalize (precomputed s/t) + W_out matmul + residual."""
    x = x_ref[0]                                                  # (C, TP) bf16
    y = jnp.dot(w_in_ref[...], x, preferred_element_type=jnp.float32)
    yn = (y * s_ref[0] + t_ref[0]).astype(jnp.bfloat16)
    out = jnp.dot(w_out_ref[...], yn, preferred_element_type=jnp.float32)
    out_ref[0] = (out + x.astype(jnp.float32) * mask_ref[...]).astype(
        out_ref.dtype)


# ---------------------------------------------------------------------------
# Wrapper helpers
# ---------------------------------------------------------------------------
def _vmem_limit_bytes():
    """Generation-aware scoped-VMEM request (never all of v7x's 64 MiB)."""
    try:
        cap = int(pltpu.get_tpu_info().vmem_capacity_bytes)
    except Exception:
        cap = 64 * 1024 * 1024            # v7x-safe fallback
    return max(32 * 1024 * 1024, int(0.7 * cap))


def _pick_samples_per_block(n, per_sample_bytes, budget):
    """Largest divisor of n fitting the budget; keep >=2 grid steps if n>1
    so both v7x TensorCores get work (single TC on v5e/v6e -> no-op)."""
    max_sb = max(1, int(budget // max(per_sample_bytes, 1)))
    if n > 1:
        max_sb = min(max_sb, max(1, n // 2))
    best = 1
    for d in range(1, n + 1):
        if n % d == 0 and d <= max_sb:
            best = d
    return best


def _pick_spatial_tile(p):
    for t in (8192, 4096, 2048, 1024, 512, 256, 128):
        if p % t == 0:
            return t
    return p


def _build_fused_weights(params, C, Cq, Ch2):
    d = 3 * Ch2
    d_pad = ((d + 15) // 16) * 16         # dense (16,128) bf16 tiles
    w_in = jnp.zeros((d_pad, C), jnp.float32)
    w_out = jnp.zeros((C, d_pad), jnp.float32)
    gamma = jnp.ones((d_pad, 1), jnp.float32)     # pad channels inert
    beta = jnp.zeros((d_pad, 1), jnp.float32)
    for i, b in enumerate("rgb"):
        w_in = w_in.at[i * Ch2:(i + 1) * Ch2, i * Cq:(i + 1) * Cq].set(
            params[f"w_in_{b}"])
        w_out = w_out.at[i * Cq:(i + 1) * Cq, i * Ch2:(i + 1) * Ch2].set(
            params[f"w_out_{b}"])
        # Bottom slab sums all three branch outputs -> base (before + x4).
        w_out = w_out.at[3 * Cq:4 * Cq, i * Ch2:(i + 1) * Ch2].set(
            params[f"w_out_{b}"])
        gamma = gamma.at[i * Ch2:(i + 1) * Ch2, 0].set(params[f"gamma_{b}"])
        beta = beta.at[i * Ch2:(i + 1) * Ch2, 0].set(params[f"beta_{b}"])
    mask = (jnp.arange(C) >= 3 * Cq).astype(jnp.float32).reshape(C, 1)
    return (w_in.astype(jnp.bfloat16), w_out.astype(jnp.bfloat16),
            gamma, beta, mask, d_pad)


# ---------------------------------------------------------------------------
# Public entry point
# ---------------------------------------------------------------------------
def cam2_pallas(x_nchw, params, *, force_spatial_tiling=False,
                spatial_tile=None):
    """x_nchw: (N, C, H, W) float32. Returns (N, C, H, W) float32."""
    N, C, H, W = x_nchw.shape
    assert C % 4 == 0
    Cq = C // 4
    Ch2 = params["w_in_r"].shape[0]
    P = H * W

    w_in, w_out, gamma, beta, mask, d_pad = _build_fused_weights(
        params, C, Cq, Ch2)

    # NCHW -> (N, C, P): contiguous reshape; cast ONCE to bf16 at the HBM
    # boundary (kernel is HBM-bandwidth bound).
    x_ncp = x_nchw.reshape(N, C, P).astype(jnp.bfloat16)

    vmem_limit = _vmem_limit_bytes()
    budget = int(0.6 * vmem_limit)
    # Rough per-sample VMEM need of the fused path (double-buffered x/out
    # blocks + y/yn temporaries).
    per_sample_bytes = P * (C * 2 * 2 + C * 4 * 2 + d_pad * 4 + d_pad * 2
                            + C * 4)
    use_fused = (not force_spatial_tiling) and per_sample_bytes <= budget

    if use_fused:
        sb = _pick_samples_per_block(N, per_sample_bytes, budget)
        nb = N // sb
        kernel = functools.partial(_cam2_fused_kernel, samples_per_block=sb)
        out_ncp = pl.pallas_call(
            kernel,
            out_shape=jax.ShapeDtypeStruct((N, C, P), jnp.float32),
            grid_spec=pltpu.PrefetchScalarGridSpec(
                num_scalar_prefetch=0,
                grid=(nb,),
                in_specs=[
                    pl.BlockSpec((sb, C, P), lambda b: (b, 0, 0)),       # x
                    pl.BlockSpec((d_pad, C), lambda b: (0, 0)),          # W_in
                    pl.BlockSpec((d_pad, 1), lambda b: (0, 0)),          # gamma
                    pl.BlockSpec((d_pad, 1), lambda b: (0, 0)),          # beta
                    pl.BlockSpec((C, d_pad), lambda b: (0, 0)),          # W_out
                    pl.BlockSpec((C, 1), lambda b: (0, 0)),              # mask
                ],
                out_specs=pl.BlockSpec((sb, C, P), lambda b: (b, 0, 0)),
            ),
            compiler_params=pltpu.CompilerParams(
                dimension_semantics=("parallel",),
                vmem_limit_bytes=vmem_limit,
            ),
        )(x_ncp, w_in, gamma, beta, w_out, mask)
        return out_ncp.reshape(N, C, H, W)

    # ---- Large-P path: two-pass, P-tiled (VMEM usage is O(C * tile)). ----
    tp = spatial_tile if spatial_tile is not None else _pick_spatial_tile(P)
    if P % tp != 0:
        # TODO(synk): ragged P (not a multiple of 128) falls back to one
        # whole-P tile; add a lane-masked stats pass if that overflows VMEM.
        tp = P
    pt = P // tp

    ssum, ssq = pl.pallas_call(
        _cam2_stats_kernel,
        out_shape=(jax.ShapeDtypeStruct((N, d_pad, 1), jnp.float32),
                   jax.ShapeDtypeStruct((N, d_pad, 1), jnp.float32)),
        grid_spec=pltpu.PrefetchScalarGridSpec(
            num_scalar_prefetch=0,
            grid=(N, pt),
            in_specs=[
                pl.BlockSpec((1, C, tp), lambda b, p: (b, 0, p)),        # x
                pl.BlockSpec((d_pad, C), lambda b, p: (0, 0)),           # W_in
            ],
            out_specs=[
                pl.BlockSpec((1, d_pad, 1), lambda b, p: (b, 0, 0)),     # sum
                pl.BlockSpec((1, d_pad, 1), lambda b, p: (b, 0, 0)),     # sumsq
            ],
        ),
        compiler_params=pltpu.CompilerParams(
            dimension_semantics=("parallel", "arbitrary"),
            vmem_limit_bytes=vmem_limit,
        ),
    )(x_ncp, w_in)

    # Tiny per-(sample, channel) norm constants, computed outside the kernel:
    # yn = y * s + t  with  s = gamma*rsqrt(var+eps),  t = beta - mu*s.
    mu = ssum / P
    var = jnp.maximum(ssq / P - mu * mu, 0.0)
    s = gamma[None] * jax.lax.rsqrt(var + _EPS)
    t = beta[None] - mu * s

    out_ncp = pl.pallas_call(
        _cam2_apply_kernel,
        out_shape=jax.ShapeDtypeStruct((N, C, P), jnp.float32),
        grid_spec=pltpu.PrefetchScalarGridSpec(
            num_scalar_prefetch=0,
            grid=(N, pt),
            in_specs=[
                pl.BlockSpec((1, C, tp), lambda b, p: (b, 0, p)),        # x
                pl.BlockSpec((1, d_pad, 1), lambda b, p: (b, 0, 0)),     # s
                pl.BlockSpec((1, d_pad, 1), lambda b, p: (b, 0, 0)),     # t
                pl.BlockSpec((d_pad, C), lambda b, p: (0, 0)),           # W_in
                pl.BlockSpec((C, d_pad), lambda b, p: (0, 0)),           # W_out
                pl.BlockSpec((C, 1), lambda b, p: (0, 0)),               # mask
            ],
            out_specs=pl.BlockSpec((1, C, tp), lambda b, p: (b, 0, p)),
        ),
        compiler_params=pltpu.CompilerParams(
            dimension_semantics=("parallel", "parallel"),
            vmem_limit_bytes=vmem_limit,
        ),
    )(x_ncp, s, t, w_in, w_out, mask)

    return out_ncp.reshape(N, C, H, W)


# ---------------------------------------------------------------------------
# Pure-JAX reference (matches the PyTorch module) + params
# ---------------------------------------------------------------------------
def cam2_reference(x, params):
    N, C, H, W = x.shape
    Cq = C // 4
    x1, x2, x3, x4 = (x[:, i * Cq:(i + 1) * Cq] for i in range(4))

    def branch(xc, w_in, gamma, beta, w_out):
        y = jnp.einsum("nchw,dc->ndhw", xc, w_in)
        mu = jnp.mean(y, axis=(2, 3), keepdims=True)
        var = jnp.mean((y - mu) ** 2, axis=(2, 3), keepdims=True)
        yn = (y - mu) / jnp.sqrt(var + _EPS)
        yn = yn * gamma[None, :, None, None] + beta[None, :, None, None]
        return jnp.einsum("ndhw,cd->nchw", yn, w_out)

    out_r = branch(x1, params["w_in_r"], params["gamma_r"],
                   params["beta_r"], params["w_out_r"])
    out_g = branch(x2, params["w_in_g"], params["gamma_g"],
                   params["beta_g"], params["w_out_g"])
    out_b = branch(x3, params["w_in_b"], params["gamma_b"],
                   params["beta_b"], params["w_out_b"])
    base = out_r + out_g + out_b + x4
    return jnp.concatenate([out_r, out_g, out_b, base], axis=1)


def make_params(key, in_channels, channels):
    Cq = in_channels // 4
    Ch2 = channels // 2
    ks = jax.random.split(key, 12)
    nrm = jax.random.normal
    return {
        # Conv weights stored as (Cout, Cin), i.e. Conv2d weight squeezed.
        "w_in_r": 0.2 * nrm(ks[0], (Ch2, Cq), jnp.float32),
        "w_in_g": 0.2 * nrm(ks[1], (Ch2, Cq), jnp.float32),
        "w_in_b": 0.2 * nrm(ks[2], (Ch2, Cq), jnp.float32),
        "w_out_r": 0.2 * nrm(ks[3], (Cq, Ch2), jnp.float32),
        "w_out_g": 0.2 * nrm(ks[4], (Cq, Ch2), jnp.float32),
        "w_out_b": 0.2 * nrm(ks[5], (Cq, Ch2), jnp.float32),
        "gamma_r": 1.0 + 0.1 * nrm(ks[6], (Ch2,), jnp.float32),
        "gamma_g": 1.0 + 0.1 * nrm(ks[7], (Ch2,), jnp.float32),
        "gamma_b": 1.0 + 0.1 * nrm(ks[8], (Ch2,), jnp.float32),
        "beta_r": 0.1 * nrm(ks[9], (Ch2,), jnp.float32),
        "beta_g": 0.1 * nrm(ks[10], (Ch2,), jnp.float32),
        "beta_b": 0.1 * nrm(ks[11], (Ch2,), jnp.float32),
    }


if __name__ == "__main__":
    key = jax.random.PRNGKey(0)
    k_x, k_p = jax.random.split(key)

    N, C, H, W = 2, 16, 16, 16        # in_channels = 16
    channels = 8                       # channels // 2 = 4
    x = jax.random.normal(k_x, (N, C, H, W), jnp.float32)
    params = make_params(k_p, C, channels)

    ref = jax.block_until_ready(cam2_reference(x, params))

    # Path A: fused whole-sample kernel (the small-feature-map path).
    out_a = jax.block_until_ready(cam2_pallas(x, params))
    assert out_a.shape == (N, C, H, W)
    # bf16 HBM input + bf16 MXU operands (f32 stats/accumulation) -> loosened tol.
    np.testing.assert_allclose(np.asarray(out_a), np.asarray(ref),
                               rtol=5e-2, atol=5e-2)

    # Path B: P-tiled two-pass kernel (the large-feature-map / v7x path),
    # forced here with a small spatial tile so accumulation is exercised.
    out_b = jax.block_until_ready(
        cam2_pallas(x, params, force_spatial_tiling=True, spatial_tile=128))
    assert out_b.shape == (N, C, H, W)
    np.testing.assert_allclose(np.asarray(out_b), np.asarray(ref),
                               rtol=5e-2, atol=5e-2)

    print("KERNEL_OK")
</pallas_src>

<mosaic_0001>
module attributes {stable_mosaic.version = 11 : i64} {
  func.func @_cam2_fused_kernel(%arg0: i32, %arg1: memref<1x16x256xbf16, #tpu.memory_space<vmem>>, %arg2: memref<16x16xbf16, #tpu.memory_space<vmem>>, %arg3: memref<16x1xf32, #tpu.memory_space<vmem>>, %arg4: memref<16x1xf32, #tpu.memory_space<vmem>>, %arg5: memref<16x16xbf16, #tpu.memory_space<vmem>>, %arg6: memref<16x1xf32, #tpu.memory_space<vmem>>, %arg7: memref<1x16x256xf32, #tpu.memory_space<vmem>>) attributes {dimension_semantics = [#tpu.dimension_semantics<parallel>], iteration_bounds = array<i64: 2>, scalar_prefetch = 0 : i64, scratch_operands = 0 : i64, tpu.core_type = #tpu.core_type<tc>, window_params = [{transform_indices = @transform_0, window_bounds = array<i64: 1, 16, 256>}, {pipeline_mode = #tpu.pipeline_mode<synchronous>, transform_indices = @transform_1, window_bounds = array<i64: 16, 16>}, {pipeline_mode = #tpu.pipeline_mode<synchronous>, transform_indices = @transform_2, window_bounds = array<i64: 16, 1>}, {pipeline_mode = #tpu.pipeline_mode<synchronous>, transform_indices = @transform_3, window_bounds = array<i64: 16, 1>}, {pipeline_mode = #tpu.pipeline_mode<synchronous>, transform_indices = @transform_4, window_bounds = array<i64: 16, 16>}, {pipeline_mode = #tpu.pipeline_mode<synchronous>, transform_indices = @transform_5, window_bounds = array<i64: 16, 1>}, {transform_indices = @transform_6, window_bounds = array<i64: 1, 16, 256>}]} {
    %c0 = arith.constant 0 : index
    %c0_0 = arith.constant 0 : index
    %0 = vector.load %arg2[%c0, %c0_0] : memref<16x16xbf16, #tpu.memory_space<vmem>>, vector<16x16xbf16>
    %c0_1 = arith.constant 0 : index
    %c0_2 = arith.constant 0 : index
    %1 = vector.load %arg5[%c0_1, %c0_2] : memref<16x16xbf16, #tpu.memory_space<vmem>>, vector<16x16xbf16>
    %c0_3 = arith.constant 0 : index
    %c0_4 = arith.constant 0 : index
    %2 = vector.load %arg3[%c0_3, %c0_4] : memref<16x1xf32, #tpu.memory_space<vmem>>, vector<16x1xf32>
    %c0_5 = arith.constant 0 : index
    %c0_6 = arith.constant 0 : index
    %3 = vector.load %arg4[%c0_5, %c0_6] : memref<16x1xf32, #tpu.memory_space<vmem>>, vector<16x1xf32>
    %c0_7 = arith.constant 0 : index
    %c0_8 = arith.constant 0 : index
    %4 = vector.load %arg6[%c0_7, %c0_8] : memref<16x1xf32, #tpu.memory_space<vmem>>, vector<16x1xf32>
    %c0_9 = arith.constant 0 : index
    %c0_10 = arith.constant 0 : index
    %c0_11 = arith.constant 0 : index
    %5 = vector.load %arg1[%c0_9, %c0_10, %c0_11] : memref<1x16x256xbf16, #tpu.memory_space<vmem>>, vector<1x16x256xbf16>
    %6 = vector.shape_cast %5 : vector<1x16x256xbf16> to vector<16x256xbf16>
    %cst = arith.constant dense<0.000000e+00> : vector<16x256xf32>
    %7 = tpu.matmul %0, %6, %cst {dimension_numbers = #tpu.dot_dimension_numbers<[1], [0], [0], [1], [0, 0, 1, 1], [], []>} : vector<16x16xbf16>, vector<16x256xbf16>, vector<16x256xf32> -> vector<16x256xf32>
    %cst_12 = arith.constant dense<0.000000e+00> : vector<16xf32>
    %8 = vector.multi_reduction <add>, %7, %cst_12 [1] : vector<16x256xf32> to vector<16xf32>
    %9 = vector.shape_cast %8 : vector<16xf32> to vector<16x1xf32>
    %cst_13 = arith.constant 2.560000e+02 : f32
    %10 = vector.broadcast %cst_13 : f32 to vector<16x1xf32>
    %11 = arith.divf %9, %10 : vector<16x1xf32>
    %12 = arith.mulf %7, %7 : vector<16x256xf32>
    %cst_14 = arith.constant dense<0.000000e+00> : vector<16xf32>
    %13 = vector.multi_reduction <add>, %12, %cst_14 [1] : vector<16x256xf32> to vector<16xf32>
    %14 = vector.shape_cast %13 : vector<16xf32> to vector<16x1xf32>
    %cst_15 = arith.constant 2.560000e+02 : f32
    %15 = vector.broadcast %cst_15 : f32 to vector<16x1xf32>
    %16 = arith.divf %14, %15 : vector<16x1xf32>
    %17 = arith.mulf %11, %11 : vector<16x1xf32>
    %18 = arith.subf %16, %17 : vector<16x1xf32>
    %cst_16 = arith.constant 0.000000e+00 : f32
    %19 = vector.broadcast %cst_16 : f32 to vector<16x1xf32>
    %20 = arith.maximumf %18, %19 : vector<16x1xf32>
    %cst_17 = arith.constant 9.99999974E-6 : f32
    %21 = vector.broadcast %cst_17 : f32 to vector<16x1xf32>
    %22 = arith.addf %20, %21 : vector<16x1xf32>
    %23 = math.rsqrt %22 : vector<16x1xf32>
    %24 = arith.mulf %2, %23 : vector<16x1xf32>
    %25 = arith.mulf %11, %24 : vector<16x1xf32>
    %26 = arith.subf %3, %25 : vector<16x1xf32>
    %27 = vector.broadcast %24 : vector<16x1xf32> to vector<16x256xf32>
    %28 = arith.mulf %7, %27 : vector<16x256xf32>
    %29 = vector.broadcast %26 : vector<16x1xf32> to vector<16x256xf32>
    %30 = arith.addf %28, %29 : vector<16x256xf32>
    %31 = arith.truncf %30 : vector<16x256xf32> to vector<16x256xbf16>
    %cst_18 = arith.constant dense<0.000000e+00> : vector<16x256xf32>
    %32 = tpu.matmul %1, %31, %cst_18 {dimension_numbers = #tpu.dot_dimension_numbers<[1], [0], [0], [1], [0, 0, 1, 1], [], []>} : vector<16x16xbf16>, vector<16x256xbf16>, vector<16x256xf32> -> vector<16x256xf32>
    %33 = arith.extf %6 : vector<16x256xbf16> to vector<16x256xf32>
    %34 = vector.broadcast %4 : vector<16x1xf32> to vector<16x256xf32>
    %35 = arith.mulf %33, %34 : vector<16x256xf32>
    %36 = arith.addf %32, %35 : vector<16x256xf32>
    %c0_19 = arith.constant 0 : index
    %c0_20 = arith.constant 0 : index
    %c0_21 = arith.constant 0 : index
    %37 = vector.load %arg7[%c0_19, %c0_20, %c0_21] : memref<1x16x256xf32, #tpu.memory_space<vmem>>, vector<1x16x256xf32>
    %38 = vector.shape_cast %37 : vector<1x16x256xf32> to vector<16x256xf32>
    %39 = vector.shape_cast %36 : vector<16x256xf32> to vector<1x16x256xf32>
    tpu.vector_store %arg7[%c0_19, %c0_20, %c0_21], %39 {strides = array<i32>} : memref<1x16x256xf32, #tpu.memory_space<vmem>>, vector<1x16x256xf32>,
    return
  }
  func.func @transform_0(%arg0: i32) -> (i32, i32, i32) {
    %c0_i32 = arith.constant 0 : i32
    %c0_i32_0 = arith.constant 0 : i32
    %c0_i32_1 = arith.constant 0 : i32
    return %arg0, %c0_i32, %c0_i32_0 : i32, i32, i32
  }
  func.func @transform_1(%arg0: i32) -> (i32, i32) {
    %c0_i32 = arith.constant 0 : i32
    %c0_i32_0 = arith.constant 0 : i32
    %c0_i32_1 = arith.constant 0 : i32
    return %c0_i32, %c0_i32_0 : i32, i32
  }
  func.func @transform_2(%arg0: i32) -> (i32, i32) {
    %c0_i32 = arith.constant 0 : i32
    %c0_i32_0 = arith.constant 0 : i32
    %c0_i32_1 = arith.constant 0 : i32
    return %c0_i32, %c0_i32_0 : i32, i32
  }
  func.func @transform_3(%arg0: i32) -> (i32, i32) {
    %c0_i32 = arith.constant 0 : i32
    %c0_i32_0 = arith.constant 0 : i32
    %c0_i32_1 = arith.constant 0 : i32
    return %c0_i32, %c0_i32_0 : i32, i32
  }
  func.func @transform_4(%arg0: i32) -> (i32, i32) {
    %c0_i32 = arith.constant 0 : i32
    %c0_i32_0 = arith.constant 0 : i32
    %c0_i32_1 = arith.constant 0 : i32
    return %c0_i32, %c0_i32_0 : i32, i32
  }
  func.func @transform_5(%arg0: i32) -> (i32, i32) {
    %c0_i32 = arith.constant 0 : i32
    %c0_i32_0 = arith.constant 0 : i32
    %c0_i32_1 = arith.constant 0 : i32
    return %c0_i32, %c0_i32_0 : i32, i32
  }
  func.func @transform_6(%arg0: i32) -> (i32, i32, i32) {
    %c0_i32 = arith.constant 0 : i32
    %c0_i32_0 = arith.constant 0 : i32
    %c0_i32_1 = arith.constant 0 : i32
    return %arg0, %c0_i32, %c0_i32_0 : i32, i32, i32
  }
}

</mosaic_0001>

<bundles_post_ra>
// kernel: tpu_custom_call.1
= control target key start
LH: loop header
LB: loop body
LE: loop exit
PB: predicated region body
PF: predicated region fallthrough
CT: control target
= control target key end

     0   :  { %11 = vsyncpa [#allocation3], 0  ;;  %s854_s0 = inlined_call_operand.vmem [shape: bf16[2,16,256], index: 0, kind: input, shape index: {}]   ;;  %s855_s1 = inlined_call_operand.vmem [shape: bf16[16,16], index: 1, kind: input, shape index: {}]   ;;  %s856_s2 = inlined_call_operand.vmem [shape: f32[16,1], index: 2, kind: input, shape index: {}]   ;;  %s857_s3 = inlined_call_operand.vmem [shape: f32[16,1], index: 3, kind: input, shape index: {}]   ;;  %s858_s4 = inlined_call_operand.vmem [shape: bf16[16,16], index: 4, kind: input, shape index: {}]   ;;  %s859_s5 = inlined_call_operand.vmem [shape: f32[16,1], index: 5, kind: input, shape index: {}]   ;;  %s860_s6 = inlined_call_operand.hbm [shape: f32[2,16,256], index: 6, kind: output, shape index: {}]  }
   0x1   :  { %13 = vsyncpa [#allocation3 + $0x1], 0  ;;  %s714_s21 = smov 0   ;;  %s716_s22 = smov 0  }
   0x2   :  { %s718_s23 = smov 0   ;;  %s720_s24 = smov 0  }
   0x3 LB: > { %s735_s25 = sadd.s32 4294967295, %s673_s24   ;;  %s541_s26 = sadd.s32 4294967294, %s673_s24   ;;  %s673_s24 = sphi %s720_s24, %s866_s24   ;;  %s669_s23 = sphi %s718_s23, %s865_s23   ;;  %s665_s22 = sphi %s716_s22, %s864_s22   ;;  %s661_s21 = sphi %s714_s21, %s863_s21  }
   0x4   : > { %s739_s27 = sadd.s32 1, %s673_s24   ;;  %s157_s28 = sadd.s32 1, %s669_s23 }
   0x5   : > { %s154_s29 = ssub.s32 %s673_s24, %s739_s27  ;;  %p167_p0 = scmp.ne.s32.totalorder %s669_s23, %s665_s22 }
   0x6   : > { %p155_p1 = scmp.eq.s32.totalorder %s154_s29, 0  ;;  %p168_p2 = scmp.eq.s32.totalorder %s735_s25, 1 }
   0x7   : > { %p173_p3 = scmp.ne.s32.totalorder %s665_s22, %s661_s21  ;;  %p174_p4 = scmp.eq.s32.totalorder %s541_s26, 1 }
   0x8   : > { %s750_s30 = scalar_select %p155_p1, %s669_s23, %s157_s28  }
   0x9   : > { %p752_p5 = por %p168_p2, %p167_p0  ;;  %p756_p6 = por %p174_p4, %p173_p3 }
   0xa   : > { %p544_p7 = scmp.ge.s32.totalorder %s673_s24, 1  ;;  %p215_p8 = scmp.lt.s32.totalorder %s673_s24, 3 }
   0xc   : > { %p216_p9 = pnand %p544_p7, %p215_p8 }
   0xd   : > { %p245_p10 = scmp.lt.s32.totalorder (!%p216_p9), %s735_s25, 1  ;;  %s242_s15 = sand.u32 (!%p216_p9), 1, %s665_s22  }
   0xe   : > { %219 = sbr.rel (%p216_p9) target bundleno = 750 (0x2ee), region = 44  ;;  %s545_s16 = sshll.u32 (!%p216_p9), %s242_s15, 5 }
   0xf   : > { %s244_s17 = scalar_lea.vmem (!%p216_p9), [#allocation2], %s545_s16  ;;  %s560_s19 = sshll.u32 (!%p216_p9), %s735_s25, 9 }
  0x10   : > { %s479_s18 = sshll.u32 (!%p216_p9), %s244_s17, 4  ;;  %s812_s28 = scalar_lea.hbm (!%p216_p9), %s860_s6, %s560_s19  ;;  %s807_s18 = int_to_ptr.vmem [resolvable:$true] %s479_s18 }
  0x11   : > { %s814_s29 = scalar_lea.sflag (!%p216_p9), [#allocation3], %s242_s15 }
  0x13   : > { %v675_v0 = vmov 0   ;;  %s246_s9 = scalar_select %p245_p10, %s735_s25, 1  ;;  %v607_v5 = vld [vmem:[%s855_s1] sm:$0xff]   ;;  %vm278_vm0 = vcmask 130048   ;;  %v256_v37 = vld [vmem:[%s856_s2 + $0x8] sm:$0xff] }
  0x14   : > { %314 = vmatprep.mubr.bf16.mxu0 %v675_v0  ;;  %603 = vset.pattern.permute.xlu0 %v675_v0  ;;  %v255_v34 = vld [vmem:[%s856_s2] sm:$0xff]  ;;  %v258_v44 = vld [vmem:[%s857_s3 + $0x8] sm:$0xff]  ;;  %s613_s25 = scalar_lea.vmem %s807_s18, 512 }
  0x15   : > { %604 = vset.pattern.permute.xlu1 %v675_v0  ;;  %450 = vmatprep.mubr.bf16.mxu1 %v675_v0  ;;  %s559_s10 = sshll.u32 %s246_s9, 4  ;;  %v257_v41 = vld [vmem:[%s857_s3] sm:$0xff]  ;;  %v260_v47 = vld [vmem:[%s859_s5 + $0x8] sm:$0xff]  ;;  %p614_p11 = scmp.ne.s32.totalorder %s807_s18, %s613_s25 }
  0x16   : > { %s249_s13 = scalar_lea.vmem %s854_s0, %s559_s10  ;;  %v259_v46 = vld [vmem:[%s859_s5] sm:$0xff]  ;;  %s676_s9 = smov [#allocation2]  }
  0x17   : > { %v767_v1 = vld [vmem:[%s249_s13] sm:$0xff]  ;;  %v769_v2 = vld [vmem:[%s249_s13 + $0x8] sm:$0xff]  ;;  %p615_p12 = pnand %p614_p11, %p752_p5  ;;  %s617_s10 = sshll.u32 %s676_s9, 4  ;;  %s618_s10 = int_to_ptr.vmem [resolvable:$false] %s617_s10 }
  0x18   : > { %v550_v3 = vcombine.high %v767_v1, %v769_v2  ;;  %v549_v4 = vcombine.low %v767_v1, %v769_v2  ;;  %v608_v62 = vld [vmem:[%s858_s4] sm:$0xff]   ;;  %v392_v0 = vunpack.c.l.bf16 %v767_v1  ;;  %s619_s11 = scalar_lea.vmem %s618_s10, 1024  ;;  %p620_p0 = scmp.lt.s32.totalorder %s807_s18, %s618_s10 }
  0x19   : > { %p616_p13 = pneg %p615_p12  ;;  %p621_p1 = scmp.lt.s32.totalorder %s619_s11, %s613_s25 }
  0x1a   : > { %296 = vmatprep.subr.bf16.mxu0 %v550_v3  ;;  %v393_v3 = vunpack.c.h.bf16 %v767_v1 }
  0x1b   : > { %297 = vmatpush1.bf16.msra.mxu0 %v549_v4  ;;  %p622_p2 = por %p621_p1, %p620_p0 }
  0x1d   : > { %p623_p3 = pnand %p622_p2, %p616_p13 }
  0x1e   : > { %551 = vmatmul.mubr.msk.bf16.vlgmr.msra.gmra.mxu0 %vm278_vm0, %v607_v5  ;;  %v394_v5 = vunpack.c.l.bf16 %v769_v2 }
  0xde   : > { %v316_v6 = vpop.f32.mrf.mxu0 }
  0xdf   : > { %v334_v9 = vmul.f32 %v316_v6, %v316_v6 }
  0xe0   : > { %v318_v7 = vpop.f32.mrf.mxu0 }
  0xe1   : > { %v325_v8 = vadd.f32 %v318_v7, %v316_v6  ;;  %v335_v10 = vmul.f32 %v318_v7, %v318_v7 }
  0xe2   : > { %v320_v11 = vpop.f32.mrf.mxu0 }
  0xe3   : > { %326 = vadd.xlane.f32.xlu0 %v325_v8  ;;  %v338_v12 = vadd.f32 %v335_v10, %v334_v9  ;;  %v336_v16 = vmul.f32 %v320_v11, %v320_v11  ;;  %v395_v9 = vunpack.c.h.bf16 %v769_v2 }
  0xe4   : > { %v322_v13 = vpop.f32.mrf.mxu0 }
  0xe5   : > { %v337_v14 = vmul.f32 %v322_v13, %v322_v13  ;;  %339 = vadd.xlane.f32.xlu1 %v338_v12  ;;  %v328_v15 = vadd.f32 %v322_v13, %v320_v11 }
  0xe7   : > { %329 = vadd.xlane.f32.xlu0 %v328_v15  ;;  %v341_v17 = vadd.f32 %v337_v14, %v336_v16 }
  0xe9   : > { %342 = vadd.xlane.f32.xlu1 %v341_v17 }
 0x16c   : > { %v327_v18 = vpop.xlane.xlu0 %326 }
 0x16d   : > { %v332_v19 = vmul.f32 0.00390625, %v327_v18 }
 0x16e   : > { %v340_v20 = vpop.xlane.xlu1 %339 }
 0x16f   : > { %v346_v21 = vmul.f32 %v332_v19, %v332_v19  ;;  %v344_v22 = vmul.f32 0.00390625, %v340_v20 }
 0x170   : > { %v330_v23 = vpop.xlane.xlu0 %329 }
 0x171   : > { %v348_v24 = vsub.f32 %v344_v22, %v346_v21  ;;  %v333_v25 = vmul.f32 0.00390625, %v330_v23 }
 0x172   : > { %v343_v26 = vpop.xlane.xlu1 %342 }
 0x173   : > { %v350_v27 = vmax.f32 %v348_v24, 0.0  ;;  %v347_v28 = vmul.f32 %v333_v25, %v333_v25  ;;  %v345_v29 = vmul.f32 0.00390625, %v343_v26 }
 0x175   : > { %v352_v30 = vadd.f32 1e-05, %v350_v27  ;;  %v349_v31 = vsub.f32 %v345_v29, %v347_v28 }
 0x177   : > { %609 = vrsqrt.f32 %v352_v30  ;;  %v351_v32 = vmax.f32 %v349_v31, 0.0 }
 0x179   : > { %v353_v33 = vadd.f32 1e-05, %v351_v32 }
 0x17b   : > { %611 = vrsqrt.f32 %v353_v33 }
 0x184   : > { %v610_v35 = vpop.eup %609 }
 0x185   : > { %v356_v36 = vmul.f32 %v610_v35, %v255_v34 }
 0x187   : > { %364 = vperm.xlu0 %603, %v356_v36   ;;  %v358_v40 = vmul.f32 %v356_v36, %v332_v19 }
 0x188   : > { %v612_v38 = vpop.eup %611 }
 0x189   : > { %v357_v39 = vmul.f32 %v612_v38, %v256_v37  ;;  %v360_v42 = vsub.f32 %v257_v41, %v358_v40 }
 0x18b   : > { %369 = vperm.xlu1 %604, %v357_v39   ;;  %v359_v43 = vmul.f32 %v357_v39, %v333_v25 }
 0x18d   : > { %v361_v45 = vsub.f32 %v258_v44, %v359_v43 }
 0x18f   : > { %378 = vperm.xlu1 %604, %v360_v42  }
 0x193   : > { %383 = vperm.xlu1 %604, %v361_v45  }
 0x197   : > { %398 = vperm.xlu1 %604, %v259_v46  }
 0x19b   : > { %403 = vperm.xlu1 %604, %v260_v47  }
 0x202   : > { %v365_v49 = vpop.permute.xlu0 %364 }
 0x203   : > { %v372_v51 = vmul.f32 %v365_v49, %v316_v6  ;;  %v373_v52 = vmul.f32 %v365_v49, %v318_v7 }
 0x206   : > { %v370_v48 = vpop.permute.xlu1 %369 }
 0x207   : > { %v374_v53 = vmul.f32 %v370_v48, %v320_v11  ;;  %v375_v54 = vmul.f32 %v370_v48, %v322_v13 }
 0x20a   : > { %v379_v50 = vpop.permute.xlu1 %378 }
 0x20b   : > { %v386_v56 = vadd.f32 %v379_v50, %v372_v51  ;;  %v387_v57 = vadd.f32 %v379_v50, %v373_v52 }
 0x20e   : > { %v384_v55 = vpop.permute.xlu1 %383 }
 0x20f   : > { %v388_v58 = vadd.f32 %v384_v55, %v374_v53  ;;  %v389_v59 = vadd.f32 %v384_v55, %v375_v54 }
 0x211   : > { %v391_v60 = vpack.c.bf16 %v389_v59, %v387_v57  ;;  %v390_v61 = vpack.c.bf16 %v388_v58, %v386_v56 }
 0x212   : > { %v399_v63 = vpop.permute.xlu1 %398 }
 0x213   : > { %432 = vmatprep.subr.bf16.mxu1 %v391_v60  ;;  %v406_v4 = vmul.f32 %v399_v63, %v392_v0  ;;  %v407_v8 = vmul.f32 %v399_v63, %v393_v3 }
 0x214   : > { %433 = vmatpush1.bf16.msra.mxu1 %v390_v61 }
 0x216   : > { %v404_v6 = vpop.permute.xlu1 %403 }
 0x217   : > { %553 = vmatmul.mubr.msk.bf16.vlgmr.msra.gmra.mxu1 %vm278_vm0, %v608_v62  ;;  %v408_v12 = vmul.f32 %v404_v6, %v394_v5  ;;  %v409_v1 = vmul.f32 %v404_v6, %v395_v9 }
 0x2d7   : > { %v452_v7 = vpop.f32.mrf.mxu1 }
 0x2d8   : > { %v453_v10 = vadd.f32 %v452_v7, %v406_v4 }
 0x2d9   : > { %v454_v11 = vpop.f32.mrf.mxu1 }
 0x2da   : > { %461 = vst [vmem:[%s244_s17] sm:$0xff] %v453_v10  ;;  %v455_v13 = vadd.f32 %v454_v11, %v407_v8 }
 0x2db   : > { %v456_v14 = vpop.f32.mrf.mxu1 }
 0x2dc   : > { %462 = vst [vmem:[%s244_s17 + $0x8] sm:$0xff] %v455_v13  ;;  %v457_v15 = vadd.f32 %v456_v14, %v408_v12 }
 0x2dd   : > { %v458_v16 = vpop.f32.mrf.mxu1 }
 0x2de   : > { %463 = vst [vmem:[%s244_s17 + $0x10] sm:$0xff] %v457_v15  ;;  %v459_v2 = vadd.f32 %v458_v16, %v409_v1 }
 0x2e0   : > { %464 = vst [vmem:[%s244_s17 + $0x18] sm:$0xff] %v459_v2 }
 0x2e1   : > { %626 = shalt.err (!%p623_p3)
}
 0x2e2   : > { %s627_s12 = scalar_lea.hbm %s812_s28, 512  ;;  %s631_s15 = scalar_lea.hbm %s860_s6, 1024 }
 0x2e3   : > { %p628_p4 = scmp.ne.s32.totalorder %s812_s28, %s627_s12  ;;  %p632_p9 = scmp.lt.s32.totalorder %s812_s28, %s860_s6 }
 0x2e4   : > { %p633_p10 = scmp.lt.s32.totalorder %s631_s15, %s627_s12 }
 0x2e5   : > { %p629_p7 = pnand %p628_p4, %p752_p5 }
 0x2e6   : > { %p634_p11 = por %p633_p10, %p632_p9 }
 0x2e7   : > { %p630_p8 = pneg %p629_p7 }
 0x2e9   : > { %p635_p12 = pnand %p634_p11, %p630_p8 }
 0x2eb   : > { %638 = shalt.err (!%p635_p12)
}
 0x2ec   : > { %s677_s19 = smov 256   ;;  %s678_s20 = smov 16  }
 0x2ed   : > { %561 = dma.vmem_to_hbm [thread:$0]  (%p752_p5), %s807_s18, 512, %s812_s28, %s814_s29, %s677_s19, %s677_s19, %s678_s20  }
 0x2ee PF: > { %p567_p13 = scmp.ge.s32.totalorder %s673_s24, 2  ;;  %s494_s26 = sand.u32 1, %s661_s21  }
 0x2ef   : > { %s495_s25 = scalar_lea.sflag [#allocation3], %s494_s26 }
 0x2f0   : > { %p564_p0 = pnand %p567_p13, %p756_p6 }
 0x2f2   : > { %p565_p1 = pneg %p564_p0 }
 0x2f4   : > { %656 = dma.done.wait (%p565_p1), %s495_s25, 512  }
 0x2f5   : > { %658 = vsyncadd (%p565_p1), %s495_s25, 4294966784  ;;  %p16_p2 = scmp.ge.s32.totalorder %s739_s27, 4   ;;  %s863_s21 = smov %s665_s22 }
 0x2f6   : > { %s864_s22 = smov %s669_s23  ;;  %s865_s23 = smov %s750_s30 }
 0x2f7   : > { %s866_s24 = smov %s739_s27  ;;  %18 = sbr.rel (!%p16_p2) target bundleno = 3 (0x3), region = 79 }
 0x2fc   :  { %500 = vsyncpa [#allocation3], 1 }
 0x2fd   :  { %502 = vsyncpa [#allocation3 + $0x1], 1 }

</bundles_post_ra>
